<compile_context>
chip_gen: v7x
topology: tpu7x:2x2x1
jax: 0.10.0
libtpu: 0.0.40
codegen_flags: <defaults>
</compile_context>

<pallas_src>
import functools

import jax
import jax.numpy as jnp
from jax import lax
from jax.experimental import pallas as pl
from jax.experimental.pallas import tpu as pltpu


# ----------------------------- Pallas kernel ----------------------------------

def _conv_stats_kernel(w_ref, p_ref, b_ref, o_ref, sum_ref, sq_ref, *,
                       valid_m, tm, nblk, has_pad):
    """Fused ReLU + transposed-conv matmul + bias + BN-statistics accumulation.

    w_ref:   (4*C_out, K)    phase-folded weight matrix (resident; same block each step)
    p_ref:   (K, tm)         tap-major 3x3 im2col patches (lanes = spatial)
    b_ref:   (4*C_out, 1)    per-(phase, channel) bias rows
    o_ref:   (4*C_out, tm)   conv output block (lane-dense)
    sum/sq:  (1, 4*C_out, 1) per-core resident accumulators
    """
    c = pl.program_id(0)          # core split (parallel)
    i = pl.program_id(1)          # spatial blocks (arbitrary / sequential per core)

    @pl.when(i == 0)
    def _():
        sum_ref[...] = jnp.zeros_like(sum_ref)
        sq_ref[...] = jnp.zeros_like(sq_ref)

    # ReLU fused here: padding zeros are unaffected by ReLU, so ReLU(patches(x))
    # equals patches(ReLU(x)).
    x = jnp.maximum(p_ref[...], 0.0)                                   # (K, tm)
    acc = jnp.dot(w_ref[...], x, preferred_element_type=jnp.float32)   # (4C_out, tm)
    acc = acc + b_ref[...]                                             # bias bcast
    o_ref[...] = acc

    # BN batch statistics.  Only blocks that overlap the zero-padded spatial tail
    # need the lane mask; everything else takes the cheap unmasked path.
    if has_pad:
        col0 = (c * nblk + i) * tm
        needs_mask = col0 + tm > valid_m

        @pl.when(jnp.logical_not(needs_mask))
        def _():
            sum_ref[0] += jnp.sum(acc, axis=1, keepdims=True)
            sq_ref[0] += jnp.sum(acc * acc, axis=1, keepdims=True)

        @pl.when(needs_mask)
        def _():
            lane = lax.broadcasted_iota(jnp.int32, (1, tm), 1) + col0
            xs = jnp.where(lane < valid_m, acc, 0.0)
            sum_ref[0] += jnp.sum(xs, axis=1, keepdims=True)
            sq_ref[0] += jnp.sum(xs * xs, axis=1, keepdims=True)
    else:
        sum_ref[0] += jnp.sum(acc, axis=1, keepdims=True)
        sq_ref[0] += jnp.sum(acc * acc, axis=1, keepdims=True)


# ------------------------------ Sizing helpers ---------------------------------

def _num_tensorcores():
    """TensorCores per chip: 2 on v7x, 1 on v5e/v6e (fallback: 1)."""
    try:
        info = pltpu.get_tpu_info()
        for attr in ("num_cores", "num_tensorcores", "tensorcore_count",
                     "num_cores_per_chip", "core_count"):
            v = getattr(info, attr, None)
            if isinstance(v, int) and 0 < v <= 8:
                return v
    except Exception:
        pass
    try:
        kind = (jax.devices()[0].device_kind or "").lower()
    except Exception:
        kind = ""
    return 2 if "v7" in kind else 1


def _pick_tm(M, K, CO4, ncores, vmem_budget_bytes):
    """Largest lane-dense tile (multiple of 128) whose double-buffered working set
    fits the VMEM budget; shrink only if M is too small to cover all cores."""
    per_tm = 2 * 4 * (K + CO4)                    # dbl-buffered patch + output tiles, f32
    fixed = 2 * 4 * (CO4 * K + CO4) + 4 * 4 * CO4  # weights + bias + stats accumulators
    tm = max(128, (int(vmem_budget_bytes) - fixed) // per_tm)
    tm = min(tm, 16384)
    tm = max(128, (tm // 128) * 128)
    while tm > 128 and M < ncores * tm:
        tm = max(128, ((tm // 2) // 128) * 128)
    return tm


# --------------------------------- Wrapper --------------------------------------

def upsample_forward(x, weight, bias, gamma, beta, *, eps=1e-5):
    """weight: (C_in, C_out, 4, 4) as in nn.ConvTranspose2d; bias/gamma/beta: (C_out,)."""
    N, C_in, H, W = x.shape
    C_out = weight.shape[1]
    M = N * H * W
    K = C_in * 9
    CO4 = 4 * C_out

    vmem_limit = 32 * 1024 * 1024                 # scoped limit; conservative for v7x 64 MiB
    ncores = _num_tensorcores()
    if M < ncores * 128:
        ncores = 1
    tm = _pick_tm(M, K, CO4, ncores, vmem_limit // 2)
    blk = ncores * tm
    Mp = ((M + blk - 1) // blk) * blk
    nblk = Mp // blk                              # spatial blocks per core
    has_pad = Mp > M

    xf = x.astype(jnp.float32)
    # One cheap input-sized transpose (C_in <-> N) so the 9x im2col is a pure
    # stack+reshape (tap-major K ordering), with no transpose of the 9x-sized data:
    #   P[(dh*3+dw)*C_in + ci, n*H*W + a*W + b] = xp[ci, n, a+dh, b+dw]
    xt = jnp.transpose(xf, (1, 0, 2, 3))                         # (C_in, N, H, W)
    xtp = jnp.pad(xt, ((0, 0), (0, 0), (1, 1), (1, 1)))          # pad 1 on H, W
    taps = [xtp[:, :, dh:dh + H, dw:dw + W] for dh in range(3) for dw in range(3)]
    P = jnp.stack(taps, axis=0).reshape(K, M)                    # (9,C_in,N,H,W)->(K,M)
    if has_pad:
        P = jnp.pad(P, ((0, 0), (0, Mp - M)))

    # Phase-folded weight matrix: row = (r*2+s)*C_out + co, col = (dh*3+dw)*C_in + ci,
    #   out[n, co, 2a+r, 2b+s] = sum_{ci,dh,dw} W[ci, co, 3+r-2dh, 3+s-2dw] * P[col, m]
    # (zero where the kernel tap index falls outside [0, 4)).
    wf = weight.astype(jnp.float32)
    Wcols = jnp.zeros((3, 3, C_in, 2, 2, C_out), jnp.float32)
    for dh in range(3):
        for dw in range(3):
            for r in range(2):
                for s in range(2):
                    kh = 3 + r - 2 * dh
                    kw = 3 + s - 2 * dw
                    if 0 <= kh < 4 and 0 <= kw < 4:
                        Wcols = Wcols.at[dh, dw, :, r, s, :].set(wf[:, :, kh, kw])
    Wmat = Wcols.reshape(K, CO4).T                               # (4*C_out, K)
    b_rows = jnp.tile(bias.astype(jnp.float32), 4).reshape(CO4, 1)

    kernel = functools.partial(_conv_stats_kernel, valid_m=M, tm=tm, nblk=nblk,
                               has_pad=has_pad)
    conv_t, sums_c, sqs_c = pl.pallas_call(
        kernel,
        out_shape=(jax.ShapeDtypeStruct((CO4, Mp), jnp.float32),
                   jax.ShapeDtypeStruct((ncores, CO4, 1), jnp.float32),
                   jax.ShapeDtypeStruct((ncores, CO4, 1), jnp.float32)),
        grid=(ncores, nblk),
        in_specs=[
            pl.BlockSpec((CO4, K), lambda c, i: (0, 0)),
            pl.BlockSpec((K, tm), lambda c, i: (0, c * nblk + i)),
            pl.BlockSpec((CO4, 1), lambda c, i: (0, 0)),
        ],
        out_specs=(
            pl.BlockSpec((CO4, tm), lambda c, i: (0, c * nblk + i)),
            pl.BlockSpec((1, CO4, 1), lambda c, i: (c, 0, 0)),
            pl.BlockSpec((1, CO4, 1), lambda c, i: (c, 0, 0)),
        ),
        compiler_params=pltpu.CompilerParams(
            dimension_semantics=("parallel", "arbitrary"),
            vmem_limit_bytes=vmem_limit),
        cost_estimate=pl.CostEstimate(
            flops=2 * Mp * K * CO4,
            transcendentals=0,
            bytes_accessed=4 * (K * Mp + CO4 * K + CO4 + CO4 * Mp + 2 * ncores * CO4)),
    )(Wmat, P, b_rows)

    # Tiny per-channel scalar math + BN affine (glue).  The affine is applied here so
    # XLA fuses it into the phase-interleave transpose it already emits — the old
    # standalone BN kernel (and its extra output read+write pass) is removed.
    count = jnp.float32(4 * M)                                   # = N * (2H) * (2W)
    ch_sum = sums_c.sum(axis=0).reshape(4, C_out).sum(axis=0)
    ch_sq = sqs_c.sum(axis=0).reshape(4, C_out).sum(axis=0)
    mean = ch_sum / count
    var = jnp.maximum(ch_sq / count - mean * mean, 0.0)          # biased; clamp cancellation
    scale_c = gamma.astype(jnp.float32) * lax.rsqrt(var + eps)
    shift_c = beta.astype(jnp.float32) - mean * scale_c
    scale_rows = jnp.tile(scale_c, 4).reshape(CO4, 1)
    shift_rows = jnp.tile(shift_c, 4).reshape(CO4, 1)

    y_t = conv_t[:, :M] * scale_rows + shift_rows
    # y_t[(r*2+s)*C_out + co, n*H*W + a*W + b] == out[n, co, 2a+r, 2b+s]
    y = y_t.reshape(2, 2, C_out, N, H, W)
    y = jnp.transpose(y, (3, 2, 4, 0, 5, 1)).reshape(N, C_out, 2 * H, 2 * W)
    return y


# ----------------------------- Reference (JAX) ----------------------------------

def upsample_reference(x, weight, bias, gamma, beta, eps=1e-5):
    xr = jnp.maximum(x, 0.0)
    C_in, C_out, _, _ = weight.shape
    # ConvTranspose2d(k=4, s=2, p=1) == dilated conv with flipped kernel, pad k-1-p=2.
    w_conv = jnp.transpose(weight[:, :, ::-1, ::-1], (1, 0, 2, 3))  # (C_out, C_in, 4, 4)
    y = jax.lax.conv_general_dilated(
        xr, w_conv, window_strides=(1, 1), padding=[(2, 2), (2, 2)],
        lhs_dilation=(2, 2), dimension_numbers=("NCHW", "OIHW", "NCHW"),
        precision=jax.lax.Precision.HIGHEST)
    y = y + bias.reshape(1, C_out, 1, 1)
    mean = jnp.mean(y, axis=(0, 2, 3), keepdims=True)
    var = jnp.mean((y - mean) ** 2, axis=(0, 2, 3), keepdims=True)
    return ((y - mean) * jax.lax.rsqrt(var + eps)
            * gamma.reshape(1, C_out, 1, 1) + beta.reshape(1, C_out, 1, 1))


# ----------------------------------- Main ----------------------------------------

if __name__ == "__main__":
    key = jax.random.PRNGKey(0)
    kx, kw, kb, kg, kbt = jax.random.split(key, 5)

    N, C_in, C_out, H, W = 2, 4, 8, 16, 16
    x = jax.random.normal(kx, (N, C_in, H, W), jnp.float32)
    weight = 0.1 * jax.random.normal(kw, (C_in, C_out, 4, 4), jnp.float32)
    bias = 0.1 * jax.random.normal(kb, (C_out,), jnp.float32)
    gamma = 1.0 + 0.1 * jax.random.normal(kg, (C_out,), jnp.float32)
    beta = 0.1 * jax.random.normal(kbt, (C_out,), jnp.float32)

    fwd = jax.jit(upsample_forward)
    out = jax.block_until_ready(fwd(x, weight, bias, gamma, beta))

    ref = jax.block_until_ready(upsample_reference(x, weight, bias, gamma, beta))
    assert out.shape == (N, C_out, 2 * H, 2 * W), out.shape
    assert bool(jnp.allclose(out, ref, atol=1e-3, rtol=1e-3)), \
        f"max abs err = {float(jnp.max(jnp.abs(out - ref)))}"

    print("KERNEL_OK")
</pallas_src>

<mosaic_0001>
module attributes {stable_mosaic.version = 11 : i64} {
  func.func @_conv_stats_kernel(%arg0: i32, %arg1: i32, %arg2: memref<32x36xf32, #tpu.memory_space<vmem>>, %arg3: memref<36x512xf32, #tpu.memory_space<vmem>>, %arg4: memref<32x1xf32, #tpu.memory_space<vmem>>, %arg5: memref<32x512xf32, #tpu.memory_space<vmem>>, %arg6: memref<1x32x1xf32, #tpu.memory_space<vmem>>, %arg7: memref<1x32x1xf32, #tpu.memory_space<vmem>>) attributes {dimension_semantics = [#tpu.dimension_semantics<parallel>, #tpu.dimension_semantics<arbitrary>], iteration_bounds = array<i64: 1, 1>, scalar_prefetch = 0 : i64, scratch_operands = 0 : i64, tpu.core_type = #tpu.core_type<tc>, window_params = [{pipeline_mode = #tpu.pipeline_mode<synchronous>, transform_indices = @transform_0, window_bounds = array<i64: 32, 36>}, {transform_indices = @transform_1, window_bounds = array<i64: 36, 512>}, {pipeline_mode = #tpu.pipeline_mode<synchronous>, transform_indices = @transform_2, window_bounds = array<i64: 32, 1>}, {transform_indices = @transform_3, window_bounds = array<i64: 32, 512>}, {transform_indices = @transform_4, window_bounds = array<i64: 1, 32, 1>}, {transform_indices = @transform_5, window_bounds = array<i64: 1, 32, 1>}]} {
    %c0_i32 = arith.constant 0 : i32
    %0 = arith.cmpi eq, %arg1, %c0_i32 : i32
    %1 = arith.extui %0 : i1 to i32
    %c0_i32_0 = arith.constant 0 : i32
    %2 = arith.cmpi ne, %1, %c0_i32_0 : i32
    scf.if %2 {
      %cst_23 = arith.constant 0.000000e+00 : f32
      %29 = vector.broadcast %cst_23 : f32 to vector<1x32x1xf32>
      %c0_24 = arith.constant 0 : index
      %c0_25 = arith.constant 0 : index
      %c0_26 = arith.constant 0 : index
      %30 = vector.load %arg6[%c0_24, %c0_25, %c0_26] : memref<1x32x1xf32, #tpu.memory_space<vmem>>, vector<1x32x1xf32>
      tpu.vector_store %arg6[%c0_24, %c0_25, %c0_26], %29 {strides = array<i32>} : memref<1x32x1xf32, #tpu.memory_space<vmem>>, vector<1x32x1xf32>,
      %cst_27 = arith.constant 0.000000e+00 : f32
      %31 = vector.broadcast %cst_27 : f32 to vector<1x32x1xf32>
      %c0_28 = arith.constant 0 : index
      %c0_29 = arith.constant 0 : index
      %c0_30 = arith.constant 0 : index
      %32 = vector.load %arg7[%c0_28, %c0_29, %c0_30] : memref<1x32x1xf32, #tpu.memory_space<vmem>>, vector<1x32x1xf32>
      tpu.vector_store %arg7[%c0_28, %c0_29, %c0_30], %31 {strides = array<i32>} : memref<1x32x1xf32, #tpu.memory_space<vmem>>, vector<1x32x1xf32>,
    } else {
    }
    %c0 = arith.constant 0 : index
    %c0_1 = arith.constant 0 : index
    %3 = vector.load %arg3[%c0, %c0_1] : memref<36x512xf32, #tpu.memory_space<vmem>>, vector<36x512xf32>
    %cst = arith.constant 0.000000e+00 : f32
    %4 = vector.broadcast %cst : f32 to vector<36x512xf32>
    %5 = arith.maximumf %3, %4 : vector<36x512xf32>
    %c0_2 = arith.constant 0 : index
    %c0_3 = arith.constant 0 : index
    %6 = vector.load %arg2[%c0_2, %c0_3] : memref<32x36xf32, #tpu.memory_space<vmem>>, vector<32x36xf32>
    %cst_4 = arith.constant dense<0.000000e+00> : vector<32x512xf32>
    %7 = tpu.matmul %6, %5, %cst_4 {dimension_numbers = #tpu.dot_dimension_numbers<[1], [0], [0], [1], [0, 0, 1, 1], [], []>} : vector<32x36xf32>, vector<36x512xf32>, vector<32x512xf32> -> vector<32x512xf32>
    %c0_5 = arith.constant 0 : index
    %c0_6 = arith.constant 0 : index
    %8 = vector.load %arg4[%c0_5, %c0_6] : memref<32x1xf32, #tpu.memory_space<vmem>>, vector<32x1xf32>
    %9 = vector.broadcast %8 : vector<32x1xf32> to vector<32x512xf32>
    %10 = arith.addf %7, %9 : vector<32x512xf32>
    %c0_7 = arith.constant 0 : index
    %c0_8 = arith.constant 0 : index
    %11 = vector.load %arg5[%c0_7, %c0_8] : memref<32x512xf32, #tpu.memory_space<vmem>>, vector<32x512xf32>
    tpu.vector_store %arg5[%c0_7, %c0_8], %10 {strides = array<i32>} : memref<32x512xf32, #tpu.memory_space<vmem>>, vector<32x512xf32>,
    %c0_9 = arith.constant 0 : index
    %c0_10 = arith.constant 0 : index
    %c0_11 = arith.constant 0 : index
    %12 = vector.load %arg6[%c0_9, %c0_10, %c0_11] : memref<1x32x1xf32, #tpu.memory_space<vmem>>, vector<1x32x1xf32>
    %13 = vector.shape_cast %12 : vector<1x32x1xf32> to vector<32x1xf32>
    %cst_12 = arith.constant dense<0.000000e+00> : vector<32xf32>
    %14 = vector.multi_reduction <add>, %10, %cst_12 [1] : vector<32x512xf32> to vector<32xf32>
    %15 = vector.shape_cast %14 : vector<32xf32> to vector<32x1xf32>
    %16 = arith.addf %13, %15 : vector<32x1xf32>
    %c0_13 = arith.constant 0 : index
    %c0_14 = arith.constant 0 : index
    %c0_15 = arith.constant 0 : index
    %17 = vector.load %arg6[%c0_13, %c0_14, %c0_15] : memref<1x32x1xf32, #tpu.memory_space<vmem>>, vector<1x32x1xf32>
    %18 = vector.shape_cast %17 : vector<1x32x1xf32> to vector<32x1xf32>
    %19 = vector.shape_cast %16 : vector<32x1xf32> to vector<1x32x1xf32>
    tpu.vector_store %arg6[%c0_13, %c0_14, %c0_15], %19 {strides = array<i32>} : memref<1x32x1xf32, #tpu.memory_space<vmem>>, vector<1x32x1xf32>,
    %c0_16 = arith.constant 0 : index
    %c0_17 = arith.constant 0 : index
    %c0_18 = arith.constant 0 : index
    %20 = vector.load %arg7[%c0_16, %c0_17, %c0_18] : memref<1x32x1xf32, #tpu.memory_space<vmem>>, vector<1x32x1xf32>
    %21 = vector.shape_cast %20 : vector<1x32x1xf32> to vector<32x1xf32>
    %22 = arith.mulf %10, %10 : vector<32x512xf32>
    %cst_19 = arith.constant dense<0.000000e+00> : vector<32xf32>
    %23 = vector.multi_reduction <add>, %22, %cst_19 [1] : vector<32x512xf32> to vector<32xf32>
    %24 = vector.shape_cast %23 : vector<32xf32> to vector<32x1xf32>
    %25 = arith.addf %21, %24 : vector<32x1xf32>
    %c0_20 = arith.constant 0 : index
    %c0_21 = arith.constant 0 : index
    %c0_22 = arith.constant 0 : index
    %26 = vector.load %arg7[%c0_20, %c0_21, %c0_22] : memref<1x32x1xf32, #tpu.memory_space<vmem>>, vector<1x32x1xf32>
    %27 = vector.shape_cast %26 : vector<1x32x1xf32> to vector<32x1xf32>
    %28 = vector.shape_cast %25 : vector<32x1xf32> to vector<1x32x1xf32>
    tpu.vector_store %arg7[%c0_20, %c0_21, %c0_22], %28 {strides = array<i32>} : memref<1x32x1xf32, #tpu.memory_space<vmem>>, vector<1x32x1xf32>,
    return
  }
  func.func @transform_0(%arg0: i32, %arg1: i32) -> (i32, i32) {
    %c0_i32 = arith.constant 0 : i32
    %c0_i32_0 = arith.constant 0 : i32
    %c0_i32_1 = arith.constant 0 : i32
    return %c0_i32, %c0_i32_0 : i32, i32
  }
  func.func @transform_1(%arg0: i32, %arg1: i32) -> (i32, i32) {
    %c1_i32 = arith.constant 1 : i32
    %0 = arith.muli %arg0, %c1_i32 : i32
    %1 = arith.addi %0, %arg1 : i32
    %c0_i32 = arith.constant 0 : i32
    %c0_i32_0 = arith.constant 0 : i32
    return %c0_i32, %1 : i32, i32
  }
  func.func @transform_2(%arg0: i32, %arg1: i32) -> (i32, i32) {
    %c0_i32 = arith.constant 0 : i32
    %c0_i32_0 = arith.constant 0 : i32
    %c0_i32_1 = arith.constant 0 : i32
    return %c0_i32, %c0_i32_0 : i32, i32
  }
  func.func @transform_3(%arg0: i32, %arg1: i32) -> (i32, i32) {
    %c1_i32 = arith.constant 1 : i32
    %0 = arith.muli %arg0, %c1_i32 : i32
    %1 = arith.addi %0, %arg1 : i32
    %c0_i32 = arith.constant 0 : i32
    %c0_i32_0 = arith.constant 0 : i32
    return %c0_i32, %1 : i32, i32
  }
  func.func @transform_4(%arg0: i32, %arg1: i32) -> (i32, i32, i32) {
    %c0_i32 = arith.constant 0 : i32
    %c0_i32_0 = arith.constant 0 : i32
    %c0_i32_1 = arith.constant 0 : i32
    return %arg0, %c0_i32, %c0_i32_0 : i32, i32, i32
  }
  func.func @transform_5(%arg0: i32, %arg1: i32) -> (i32, i32, i32) {
    %c0_i32 = arith.constant 0 : i32
    %c0_i32_0 = arith.constant 0 : i32
    %c0_i32_1 = arith.constant 0 : i32
    return %arg0, %c0_i32, %c0_i32_0 : i32, i32, i32
  }
}

</mosaic_0001>

<bundles_post_ra>
// kernel: tile.18
= control target key start
LH: loop header
LB: loop body
LE: loop exit
PB: predicated region body
PF: predicated region fallthrough
CT: control target
= control target key end

     0   :  { %s22_s0 = inlined_call_operand.vmem [shape: f32[8], index: 0, kind: input, shape index: {}]   ;;  %s23_s1 = inlined_call_operand.vmem [shape: f32[4,8], index: 1, kind: output, shape index: {}]  }
   0x1   :  { %v4_v0 = vld [vmem:[%s22_s0] ss:$0 sm:$0xff] }
   0x2   :  { %5 = vst [vmem:[%s23_s1] sm:$0xf] %v4_v0 }

// kernel: tile.0
= control target key start
LH: loop header
LB: loop body
LE: loop exit
PB: predicated region body
PF: predicated region fallthrough
CT: control target
= control target key end

     0   :  { %s66_s8 = smov 125   ;;  %vm7_vm0 = vcmask 7168   ;;  %s67_s11 = smov 126   ;;  %s117_s0 = inlined_call_operand.vmem [shape: f32[4,8], index: 0, kind: input, shape index: {}]   ;;  %s118_s1 = inlined_call_operand.vmem [shape: f32[32,1], index: 1, kind: output, shape index: {}]  }
   0x1   :  { %v4_v0 = vld [vmem:[%s117_s0] sm:$0xf]  ;;  %s65_s0 = smov 127   ;;  %s68_s12 = smov 124  }
   0x2   :  { %5 = vst [vmem:[#allocation0] sm:$0xf] %v4_v0  ;;  %s69_s13 = smov 123   ;;  %s70_s14 = smov 122  }
   0x3   :  { %s71_s15 = smov 121  }
   0x9   :  { %v9_v1 = vld [vmem:[#allocation0] sm:$0xf]  }
   0xa   :  { %v21_v2 = vld [vmem:[#allocation0] sm:$0xf]   ;;  %10 = vrot.lane.b32.xlu0 %v9_v1, %s65_s0 }
   0xb   :  { %22 = vrot.lane.b32.xlu1 %v21_v2, %s66_s8  ;;  %v15_v3 = vld [vmem:[#allocation0] sm:$0xf]  }
   0xc   :  { %v27_v4 = vld [vmem:[#allocation0] sm:$0xf]  }
   0xd   :  { %v6_v5 = vld [vmem:[#allocation0] sm:$0xf]  }
   0xe   :  { %8 = vst.msk [vmem:[%s118_s1] ss:$8 sm:$0xf] %vm7_vm0, %v6_v5   ;;  %16 = vrot.lane.b32.xlu0 %v15_v3, %s67_s11  ;;  %v33_v6 = vld [vmem:[#allocation0] sm:$0xf]  }
   0xf   :  { %28 = vrot.lane.b32.xlu1 %v27_v4, %s68_s12  ;;  %v39_v7 = vld [vmem:[#allocation0] sm:$0xf]  }
  0x10   :  { %v45_v8 = vld [vmem:[#allocation0] sm:$0xf]  }
  0x12   :  { %34 = vrot.lane.b32.xlu0 %v33_v6, %s69_s13 }
  0x13   :  { %40 = vrot.lane.b32.xlu1 %v39_v7, %s70_s14 }
  0x16   :  { %46 = vrot.lane.b32.xlu0 %v45_v8, %s71_s15 }
  0x7c   :  { %v11_v9 = vpop.permute.xlu0 %10  }
  0x7d   :  { %v23_v10 = vpop.permute.xlu1 %22   ;;  %51 = vst.msk [vmem:[%s118_s1 + $0x1] ss:$8 sm:$0xf] %vm7_vm0, %v11_v9  }
  0x7e   :  { %53 = vst.msk [vmem:[%s118_s1 + $0x3] ss:$8 sm:$0xf] %vm7_vm0, %v23_v10  }
  0x80   :  { %v17_v11 = vpop.permute.xlu0 %16  }
  0x81   :  { %v29_v12 = vpop.permute.xlu1 %28   ;;  %52 = vst.msk [vmem:[%s118_s1 + $0x2] ss:$8 sm:$0xf] %vm7_vm0, %v17_v11  }
  0x82   :  { %54 = vst.msk [vmem:[%s118_s1 + $0x4] ss:$8 sm:$0xf] %vm7_vm0, %v29_v12  }
  0x84   :  { %v35_v13 = vpop.permute.xlu0 %34  }
  0x85   :  { %v41_v14 = vpop.permute.xlu1 %40   ;;  %55 = vst.msk [vmem:[%s118_s1 + $0x5] ss:$8 sm:$0xf] %vm7_vm0, %v35_v13  }
  0x86   :  { %56 = vst.msk [vmem:[%s118_s1 + $0x6] ss:$8 sm:$0xf] %vm7_vm0, %v41_v14  }
  0x88   :  { %v47_v15 = vpop.permute.xlu0 %46  }
  0x89   :  { %57 = vst.msk [vmem:[%s118_s1 + $0x7] ss:$8 sm:$0xf] %vm7_vm0, %v47_v15  }

// kernel: upsample_forward.1
= control target key start
LH: loop header
LB: loop body
LE: loop exit
PB: predicated region body
PF: predicated region fallthrough
CT: control target
= control target key end

     0   :  { %v507_v3 = vmov 0.0   ;;  %v508_v10 = vmov 0   ;;  %vm147_vm0 = vcmask 1043456   ;;  %vm134_vm1 = vcmask 293888   ;;  %s787_s1 = inlined_call_operand.vmem [shape: f32[36,512], index: 1, kind: input, shape index: {}]   ;;  %s788_s2 = inlined_call_operand.vmem [shape: f32[32,1], index: 2, kind: input, shape index: {}]   ;;  %s789_s0 = inlined_call_operand.vmem [shape: f32[32,36], index: 0, kind: input, shape index: {}]   ;;  %s790_s4 = inlined_call_operand.vmem [shape: f32[1,32,1], index: 4, kind: output, shape index: {1}]   ;;  %s791_s3 = inlined_call_operand.vmem [shape: f32[32,512], index: 3, kind: output, shape index: {0}]   ;;  %s792_s5 = inlined_call_operand.vmem [shape: f32[1,32,1], index: 5, kind: output, shape index: {2}]  }
   0x1   :  { %v67_v0 = vld [vmem:[%s787_s1 + $0x8] sm:$0xff]  ;;  %v69_v2 = vld [vmem:[%s787_s1 + $0x18] sm:$0xff]  ;;  %224 = vmatprep.mubr.f32.mxu0 %v507_v3  ;;  %313 = vmatprep.mubr.f32.mxu1 %v507_v3  ;;  %v66_v8 = vld [vmem:[%s787_s1] sm:$0xff]  ;;  %vm57_vm2 = vcmask 7168  }
   0x2   :  { %v71_v1 = vld [vmem:[%s787_s1 + $0x28] sm:$0xff]  ;;  %v87_v4 = vmax.f32 %v67_v0, 0.0  ;;  %v73_v6 = vld [vmem:[%s787_s1 + $0x38] sm:$0xff]  ;;  %v89_v7 = vmax.f32 %v69_v2, 0.0  ;;  %v70_v9 = vld [vmem:[%s787_s1 + $0x20] sm:$0xff]  ;;  %505 = vset.pattern.permute.xlu0 %v508_v10  ;;  %506 = vset.pattern.permute.xlu1 %v508_v10  ;;  %v86_v12 = vmax.f32 %v66_v8, 0.0 }
   0x3   :  { %v91_v5 = vmax.f32 %v71_v1, 0.0  ;;  %v93_v11 = vmax.f32 %v73_v6, 0.0  ;;  %v90_v13 = vmax.f32 %v70_v9, 0.0  ;;  %v68_v14 = vld [vmem:[%s787_s1 + $0x10] sm:$0xff]  ;;  %v75_v16 = vld [vmem:[%s787_s1 + $0x48] sm:$0xff]  ;;  %v77_v22 = vld [vmem:[%s787_s1 + $0x58] sm:$0xff] }
   0x4   :  { %v72_v15 = vld [vmem:[%s787_s1 + $0x30] sm:$0xff]  ;;  %v88_v18 = vmax.f32 %v68_v14, 0.0  ;;  %v79_v20 = vld [vmem:[%s787_s1 + $0x68] sm:$0xff]  ;;  %v95_v21 = vmax.f32 %v75_v16, 0.0  ;;  %v81_v23 = vld [vmem:[%s787_s1 + $0x78] sm:$0xff]  ;;  %v97_v27 = vmax.f32 %v77_v22, 0.0 }
   0x5   :  { %v487_v17 = vpack.c.bf16 %v91_v5, %v87_v4  ;;  %v92_v19 = vmax.f32 %v72_v15, 0.0  ;;  %v495_v24 = vpack.c.bf16 %v93_v11, %v89_v7  ;;  %v489_v25 = vpack.c.bf16 %v90_v13, %v86_v12  ;;  %v74_v28 = vld [vmem:[%s787_s1 + $0x40] sm:$0xff]  ;;  %v76_v30 = vld [vmem:[%s787_s1 + $0x50] sm:$0xff]  ;;  %v83_v36 = vld [vmem:[%s787_s1 + $0x88] sm:$0xf]  ;;  %58 = vst.msk [vmem:[%s790_s4] sm:$0xff] %vm57_vm2, %v507_v3 }
   0x6   :  { %v99_v26 = vmax.f32 %v79_v20, 0.0  ;;  %v78_v29 = vld [vmem:[%s787_s1 + $0x60] sm:$0xff]  ;;  %v101_v32 = vmax.f32 %v81_v23, 0.0  ;;  %v94_v33 = vmax.f32 %v74_v28, 0.0  ;;  %v80_v35 = vld [vmem:[%s787_s1 + $0x70] sm:$0xff]  ;;  %v96_v38 = vmax.f32 %v76_v30, 0.0 }
   0x7   :  { %488 = vmatprep.subr.bf16.mxu0 %v487_v17  ;;  %v497_v31 = vpack.c.bf16 %v92_v19, %v88_v18  ;;  %v98_v34 = vmax.f32 %v78_v29, 0.0  ;;  %496 = vmatprep.subr.bf16.mxu1 %v495_v24  ;;  %v100_v39 = vmax.f32 %v80_v35, 0.0  ;;  %v85_v40 = vld [vmem:[%s787_s1 + $0x98] sm:$0xf]  ;;  %v103_v43 = vmax.f32 %v83_v36, 0.0  ;;  %v110_v48 = vld [vmem:[%s788_s2] sm:$0xff] }
   0x8   :  { %490 = vmatpush1.bf16.msra.mxu0 %v489_v25  ;;  %v491_v37 = vpack.c.bf16 %v99_v26, %v95_v21  ;;  %v499_v41 = vpack.c.bf16 %v101_v32, %v97_v27  ;;  %v82_v44 = vld [vmem:[%s787_s1 + $0x80] sm:$0xf]  ;;  %v105_v46 = vmax.f32 %v85_v40, 0.0  ;;  %v84_v47 = vld [vmem:[%s787_s1 + $0x90] sm:$0xf]  ;;  %116 = vperm.xlu0 %505, %v110_v48   ;;  %v111_v51 = vld [vmem:[%s788_s2 + $0x8] sm:$0xff] }
   0x9   :  { %498 = vmatpush1.bf16.msra.mxu1 %v497_v31  ;;  %v493_v42 = vpack.c.bf16 %v98_v34, %v94_v33  ;;  %v501_v45 = vpack.c.bf16 %v100_v39, %v96_v38  ;;  %v112_v49 = vld [vmem:[%s788_s2 + $0x10] sm:$0xff]  ;;  %v102_v50 = vmax.f32 %v82_v44, 0.0  ;;  %v104_v52 = vmax.f32 %v84_v47, 0.0  ;;  %v113_v53 = vld [vmem:[%s788_s2 + $0x18] sm:$0xff]  ;;  %v106_v54 = vld [vmem:[%s789_s0] sm:$0xff]  ;;  %59 = vst.msk [vmem:[%s790_s4 + $0x8] sm:$0xff] %vm57_vm2, %v507_v3 }
   0xa   :  { %492 = vmatprep.subr.bf16.mxu0 %v491_v37  ;;  %500 = vmatprep.subr.bf16.mxu1 %v499_v41  ;;  %v107_v55 = vld [vmem:[%s789_s0 + $0x8] sm:$0xff]  ;;  %v108_v56 = vld [vmem:[%s789_s0 + $0x10] sm:$0xff]  ;;  %v109_v57 = vld [vmem:[%s789_s0 + $0x18] sm:$0xff]  ;;  %60 = vst.msk [vmem:[%s790_s4 + $0x10] sm:$0xff] %vm57_vm2, %v507_v3 }
   0xb   :  { %126 = vperm.xlu1 %506, %v112_v49   ;;  %61 = vst.msk [vmem:[%s790_s4 + $0x18] sm:$0xff] %vm57_vm2, %v507_v3  ;;  %62 = vst.msk [vmem:[%s792_s5] sm:$0xff] %vm57_vm2, %v507_v3 }
   0xc   :  { %494 = vmatpush1.bf16.msra.mxu0 %v493_v42  ;;  %121 = vperm.xlu0 %505, %v111_v51   ;;  %63 = vst.msk [vmem:[%s792_s5 + $0x8] sm:$0xff] %vm57_vm2, %v507_v3  ;;  %64 = vst.msk [vmem:[%s792_s5 + $0x10] sm:$0xff] %vm57_vm2, %v507_v3 }
   0xd   :  { %502 = vmatpush1.bf16.msra.mxu1 %v501_v45  ;;  %475 = vmatprep.subr.msk.mxu0 %vm147_vm0, %v103_v43  ;;  %65 = vst.msk [vmem:[%s792_s5 + $0x18] sm:$0xff] %vm57_vm2, %v507_v3 }
   0xe   :  { %481 = vmatprep.subr.msk.mxu1 %vm147_vm0, %v105_v46 }
   0xf   :  { %131 = vperm.xlu1 %506, %v113_v53  }
  0x10   :  { %476 = vmatpush1.msk.msra.mxu0 %vm147_vm0, %v102_v50 }
  0x11   :  { %482 = vmatpush1.msk.msra.mxu1 %vm147_vm0, %v104_v52  ;;  %477 = vmatmul.mubr.msk.f32.vlgmr.msra.gmra.mrb[0].mxu0 %vm134_vm1, %v106_v54 }
  0x12   :  { %483 = vmatmul.mubr.msk.f32.vlgmr.msra.gmra.mrb[0].mxu1 %vm134_vm1, %v106_v54  ;;  %230 = vmatprep.mubr.f32.mxu0 %v507_v3 }
  0x13   :  { %319 = vmatprep.mubr.f32.mxu1 %v507_v3 }
  0x15   :  { %478 = vmatmul.mubr.msk.f32.gmra.mrb[2].mxu0 %vm134_vm1, %v107_v55 }
  0x16   :  { %484 = vmatmul.mubr.msk.f32.gmra.mrb[2].mxu1 %vm134_vm1, %v107_v55  ;;  %236 = vmatprep.mubr.f32.mxu0 %v507_v3 }
  0x17   :  { %325 = vmatprep.mubr.f32.mxu1 %v507_v3 }
  0x19   :  { %479 = vmatmul.mubr.msk.f32.gmra.mrb[4].mxu0 %vm134_vm1, %v108_v56 }
  0x1a   :  { %485 = vmatmul.mubr.msk.f32.gmra.mrb[4].mxu1 %vm134_vm1, %v108_v56  ;;  %242 = vmatprep.mubr.f32.mxu0 %v507_v3 }
  0x1b   :  { %331 = vmatprep.mubr.f32.mxu1 %v507_v3 }
  0x1d   :  { %480 = vmatmul.mubr.msk.f32.gmra.mrb[6].mxu0 %vm134_vm1, %v109_v57 }
  0x1e   :  { %486 = vmatmul.mubr.msk.f32.gmra.mrb[6].mxu1 %vm134_vm1, %v109_v57 }
  0x87   :  { %v117_v58 = vpop.permute.xlu0 %116 }
  0x8a   :  { %v127_v5 = vpop.permute.xlu1 %126 }
  0x8b   :  { %v122_v6 = vpop.permute.xlu0 %121 }
  0x8e   :  { %v132_v32 = vpop.permute.xlu1 %131 }
  0xe4   :  { %v226_v59 = vpop.f32.mrb[0].mxu0 }
  0xe5   :  { %v227_v60 = vadd.f32 %v226_v59, %v117_v58  ;;  %v315_v61 = vpop.f32.mrb[0].mxu1  ;;  %v228_v62 = vpop.f32.mrb[1].mxu0 }
  0xe6   :  { %v316_v63 = vadd.f32 %v315_v61, %v117_v58  ;;  %v229_v0 = vadd.f32 %v228_v62, %v117_v58  ;;  %v317_v1 = vpop.f32.mrb[1].mxu1 }
  0xe7   :  { %338 = vst [vmem:[%s791_s3] sm:$0xff] %v227_v60  ;;  %v391_v2 = vmul.f32 %v227_v60, %v227_v60  ;;  %v318_v4 = vadd.f32 %v317_v1, %v117_v58 }
  0xe8   :  { %340 = vst [vmem:[%s791_s3 + $0x10] sm:$0xff] %v316_v63  ;;  %339 = vst [vmem:[%s791_s3 + $0x8] sm:$0xff] %v229_v0  ;;  %v358_v7 = vadd.f32 %v229_v0, %v227_v60  ;;  %v392_v8 = vmul.f32 %v229_v0, %v229_v0  ;;  %v232_v9 = vpop.f32.mrb[2].mxu0  ;;  %v393_v18 = vmul.f32 %v316_v63, %v316_v63 }
  0xe9   :  { %341 = vst [vmem:[%s791_s3 + $0x18] sm:$0xff] %v318_v4  ;;  %v233_v10 = vadd.f32 %v232_v9, %v122_v6  ;;  %v321_v11 = vpop.f32.mrb[2].mxu1  ;;  %v234_v12 = vpop.f32.mrb[3].mxu0  ;;  %v394_v28 = vmul.f32 %v318_v4, %v318_v4 }
  0xea   :  { %v322_v13 = vadd.f32 %v321_v11, %v122_v6  ;;  %v235_v14 = vadd.f32 %v234_v12, %v122_v6  ;;  %v323_v15 = vpop.f32.mrb[3].mxu1  ;;  %v359_v16 = vadd.f32 %v358_v7, %v316_v63  ;;  %v407_v17 = vadd.f32 %v392_v8, %v391_v2  ;;  %v354_v8 = vld [vmem:[%s790_s4] sm:$0xff] }
  0xeb   :  { %342 = vst [vmem:[%s791_s3 + $0x20] sm:$0xff] %v233_v10  ;;  %v395_v19 = vmul.f32 %v233_v10, %v233_v10  ;;  %v324_v20 = vadd.f32 %v323_v15, %v122_v6  ;;  %v387_v11 = vld [vmem:[%s792_s5] sm:$0xff] }
  0xec   :  { %344 = vst [vmem:[%s791_s3 + $0x30] sm:$0xff] %v322_v13  ;;  %343 = vst [vmem:[%s791_s3 + $0x28] sm:$0xff] %v235_v14  ;;  %v363_v21 = vadd.f32 %v235_v14, %v233_v10  ;;  %v396_v22 = vmul.f32 %v235_v14, %v235_v14  ;;  %v238_v23 = vpop.f32.mrb[4].mxu0  ;;  %v360_v24 = vadd.f32 %v359_v16, %v318_v4  ;;  %v388_v14 = vld [vmem:[%s792_s5 + $0x8] sm:$0xff] }
  0xed   :  { %345 = vst [vmem:[%s791_s3 + $0x38] sm:$0xff] %v324_v20  ;;  %v239_v25 = vadd.f32 %v238_v23, %v127_v5  ;;  %v240_v26 = vpop.f32.mrb[5].mxu0  ;;  %v327_v27 = vpop.f32.mrb[4].mxu1  ;;  %v408_v29 = vadd.f32 %v407_v17, %v393_v18  ;;  %v397_v36 = vmul.f32 %v322_v13, %v322_v13  ;;  %v398_v48 = vmul.f32 %v324_v20, %v324_v20 }
  0xee   :  { %v241_v30 = vadd.f32 %v240_v26, %v127_v5  ;;  %v328_v31 = vadd.f32 %v327_v27, %v127_v5  ;;  %361 = vadd.xlane.f32.xlu0 %v360_v24  ;;  %v329_v33 = vpop.f32.mrb[5].mxu1  ;;  %v364_v34 = vadd.f32 %v363_v21, %v322_v13  ;;  %v412_v35 = vadd.f32 %v396_v22, %v395_v19  ;;  %v355_v13 = vld [vmem:[%s790_s4 + $0x8] sm:$0xff]  ;;  %v389_v19 = vld [vmem:[%s792_s5 + $0x10] sm:$0xff] }
  0xef   :  { %346 = vst [vmem:[%s791_s3 + $0x40] sm:$0xff] %v239_v25  ;;  %v399_v37 = vmul.f32 %v239_v25, %v239_v25  ;;  %v330_v38 = vadd.f32 %v329_v33, %v127_v5  ;;  %v409_v39 = vadd.f32 %v408_v29, %v394_v28  ;;  %v390_v28 = vld [vmem:[%s792_s5 + $0x18] sm:$0xff] }
  0xf0   :  { %347 = vst [vmem:[%s791_s3 + $0x48] sm:$0xff] %v241_v30  ;;  %v368_v40 = vadd.f32 %v241_v30, %v239_v25  ;;  %v400_v41 = vmul.f32 %v241_v30, %v241_v30  ;;  %348 = vst [vmem:[%s791_s3 + $0x50] sm:$0xff] %v328_v31  ;;  %v401_v42 = vmul.f32 %v328_v31, %v328_v31  ;;  %v244_v43 = vpop.f32.mrb[6].mxu0  ;;  %v357_v25 = vld [vmem:[%s790_s4 + $0x18] sm:$0xff] }
  0xf1   :  { %v365_v44 = vadd.f32 %v364_v34, %v324_v20  ;;  %349 = vst [vmem:[%s791_s3 + $0x58] sm:$0xff] %v330_v38  ;;  %v245_v45 = vadd.f32 %v244_v43, %v132_v32  ;;  %v333_v46 = vpop.f32.mrb[6].mxu1  ;;  %410 = vadd.xlane.f32.xlu1 %v409_v39  ;;  %v246_v47 = vpop.f32.mrb[7].mxu0  ;;  %v413_v49 = vadd.f32 %v412_v35, %v397_v36  ;;  %v356_v20 = vld [vmem:[%s790_s4 + $0x10] sm:$0xff] }
  0xf2   :  { %v334_v50 = vadd.f32 %v333_v46, %v132_v32  ;;  %v247_v51 = vadd.f32 %v246_v47, %v132_v32  ;;  %v335_v52 = vpop.f32.mrb[7].mxu1  ;;  %v417_v53 = vadd.f32 %v400_v41, %v399_v37  ;;  %v369_v54 = vadd.f32 %v368_v40, %v328_v31 }
  0xf3   :  { %350 = vst [vmem:[%s791_s3 + $0x60] sm:$0xff] %v245_v45  ;;  %v403_v55 = vmul.f32 %v245_v45, %v245_v45  ;;  %v336_v56 = vadd.f32 %v335_v52, %v132_v32  ;;  %v414_v57 = vadd.f32 %v413_v49, %v398_v48  ;;  %v402_v60 = vmul.f32 %v330_v38, %v330_v38 }
  0xf4   :  { %352 = vst [vmem:[%s791_s3 + $0x70] sm:$0xff] %v334_v50  ;;  %351 = vst [vmem:[%s791_s3 + $0x68] sm:$0xff] %v247_v51  ;;  %v373_v58 = vadd.f32 %v247_v51, %v245_v45  ;;  %v404_v59 = vmul.f32 %v247_v51, %v247_v51  ;;  %v418_v61 = vadd.f32 %v417_v53, %v401_v42 }
  0xf5   :  { %353 = vst [vmem:[%s791_s3 + $0x78] sm:$0xff] %v336_v56  ;;  %366 = vadd.xlane.f32.xlu1 %v365_v44  ;;  %415 = vadd.xlane.f32.xlu0 %v414_v57  ;;  %v370_v62 = vadd.f32 %v369_v54, %v330_v38  ;;  %v405_v63 = vmul.f32 %v334_v50, %v334_v50 }
  0xf6   :  { %v419_v0 = vadd.f32 %v418_v61, %v402_v60  ;;  %v374_v1 = vadd.f32 %v373_v58, %v334_v50  ;;  %v422_v2 = vadd.f32 %v404_v59, %v403_v55  ;;  %v406_v5 = vmul.f32 %v336_v56, %v336_v56 }
  0xf8   :  { %v375_v4 = vadd.f32 %v374_v1, %v336_v56  ;;  %v423_v6 = vadd.f32 %v422_v2, %v405_v63 }
  0xf9   :  { %420 = vadd.xlane.f32.xlu1 %v419_v0  ;;  %371 = vadd.xlane.f32.xlu0 %v370_v62 }
  0xfa   :  { %v424_v7 = vadd.f32 %v423_v6, %v406_v5 }
  0xfd   :  { %376 = vadd.xlane.f32.xlu0 %v375_v4 }
 0x101   :  { %425 = vadd.xlane.f32.xlu0 %v424_v7 }
 0x17b   :  { %v362_v9 = vpop.xlane.xlu0 %361 }
 0x17c   :  { %v378_v10 = vadd.f32 %v362_v9, %v354_v8 }
 0x17e   :  { %383 = vst.msk [vmem:[%s790_s4] sm:$0xff] %vm57_vm2, %v378_v10  ;;  %v411_v3 = vpop.xlane.xlu1 %410 }
 0x17f   :  { %v427_v12 = vadd.f32 %v411_v3, %v387_v11 }
 0x181   :  { %431 = vst.msk [vmem:[%s792_s5] sm:$0xff] %vm57_vm2, %v427_v12 }
 0x182   :  { %v367_v15 = vpop.xlane.xlu1 %366  ;;  %v416_v16 = vpop.xlane.xlu0 %415 }
 0x183   :  { %v379_v17 = vadd.f32 %v367_v15, %v355_v13  ;;  %v428_v18 = vadd.f32 %v416_v16, %v388_v14 }
 0x185   :  { %384 = vst.msk [vmem:[%s790_s4 + $0x8] sm:$0xff] %vm57_vm2, %v379_v17  ;;  %432 = vst.msk [vmem:[%s792_s5 + $0x8] sm:$0xff] %vm57_vm2, %v428_v18 }
 0x186   :  { %v421_v21 = vpop.xlane.xlu1 %420  ;;  %v372_v22 = vpop.xlane.xlu0 %371 }
 0x187   :  { %v429_v23 = vadd.f32 %v421_v21, %v389_v19  ;;  %v380_v24 = vadd.f32 %v372_v22, %v356_v20 }
 0x189   :  { %433 = vst.msk [vmem:[%s792_s5 + $0x10] sm:$0xff] %vm57_vm2, %v429_v23  ;;  %385 = vst.msk [vmem:[%s790_s4 + $0x10] sm:$0xff] %vm57_vm2, %v380_v24 }
 0x18a   :  { %v377_v26 = vpop.xlane.xlu0 %376 }
 0x18b   :  { %v381_v27 = vadd.f32 %v377_v26, %v357_v25 }
 0x18d   :  { %386 = vst.msk [vmem:[%s790_s4 + $0x18] sm:$0xff] %vm57_vm2, %v381_v27 }
 0x18e   :  { %v426_v29 = vpop.xlane.xlu0 %425 }
 0x18f   :  { %v430_v30 = vadd.f32 %v426_v29, %v390_v28 }
 0x191   :  { %434 = vst.msk [vmem:[%s792_s5 + $0x18] sm:$0xff] %vm57_vm2, %v430_v30 }

</bundles_post_ra>
